<compile_context>
chip_gen: v6e
topology: v6e:2x2x1
jax: 0.10.0
libtpu: 0.0.40
codegen_flags: <defaults>
</compile_context>

<pallas_src>
import math

import jax
import jax.numpy as jnp
from jax.experimental import pallas as pl
from jax.experimental.pallas import tpu as pltpu


def _round_up(n, m):
    return ((n + m - 1) // m) * m


def _sage_prelu_kernel(a_ref, xk_ref, xi_ref, wl_ref, wr_ref, b_ref, alpha_ref,
                       o_ref, acc_ref):
    """One fused SAGEConv(mean) + PReLU layer, tiled over (rows, contraction).

    a_ref:     (TM, TK)  bf16  row-normalized adjacency tile
    xk_ref:    (TK, Cp)  bf16  input features (contraction-indexed, aggregation)
    xi_ref:    (TM, Cp)  bf16  input features (row-indexed, root/self term)
    wl_ref:    (Cp, Hp)  bf16  weight on aggregated neighbors
    wr_ref:    (Cp, Hp)  bf16  weight on root/self features
    b_ref:     (1, Hp)   f32   bias
    alpha_ref: (1, Hp)   f32   per-channel PReLU slope
    o_ref:     (TM, Hp)  f32   output tile
    acc_ref:   (TM, Cp)  f32   VMEM scratch: running sum of A @ X over k
    """
    k = pl.program_id(1)

    @pl.when(k == 0)
    def _():
        acc_ref[...] = jnp.zeros_like(acc_ref)

    # Partial neighbor-mean aggregation for this contraction slice (MXU, f32 acc).
    acc_ref[...] += jnp.dot(a_ref[...], xk_ref[...],
                            preferred_element_type=jnp.float32)

    # Epilogue only once per row tile: linear layers + bias + PReLU.
    @pl.when(k == pl.num_programs(1) - 1)
    def _():
        agg = acc_ref[...].astype(jnp.bfloat16)
        h = jnp.dot(agg, wl_ref[...], preferred_element_type=jnp.float32)
        h = h + jnp.dot(xi_ref[...], wr_ref[...],
                        preferred_element_type=jnp.float32)
        h = h + b_ref[...]
        alpha = alpha_ref[...]
        o_ref[...] = jnp.where(h > 0, h, alpha * h).astype(o_ref.dtype)


def sage_prelu_layer(A, X, Wl, Wr, b2, alpha2, *, tile_m, tile_k):
    """A: (Np, Np) bf16; X: (Np, Cp) bf16; Wl/Wr: (Cp, Hp) bf16;
    b2/alpha2: (1, Hp) f32.  Returns (Np, Hp) f32."""
    Np = A.shape[0]
    Cp = X.shape[1]
    Hp = Wl.shape[1]
    assert Np % tile_m == 0 and Np % tile_k == 0

    return pl.pallas_call(
        _sage_prelu_kernel,
        out_shape=jax.ShapeDtypeStruct((Np, Hp), jnp.float32),
        grid_spec=pltpu.PrefetchScalarGridSpec(
            num_scalar_prefetch=0,
            grid=(Np // tile_m, Np // tile_k),
            in_specs=[
                pl.BlockSpec((tile_m, tile_k), lambda i, k: (i, k)),  # A tile
                pl.BlockSpec((tile_k, Cp), lambda i, k: (k, 0)),      # X (agg)
                pl.BlockSpec((tile_m, Cp), lambda i, k: (i, 0)),      # X (root)
                pl.BlockSpec((Cp, Hp), lambda i, k: (0, 0)),          # Wl resident
                pl.BlockSpec((Cp, Hp), lambda i, k: (0, 0)),          # Wr resident
                pl.BlockSpec((1, Hp), lambda i, k: (0, 0)),           # bias
                pl.BlockSpec((1, Hp), lambda i, k: (0, 0)),           # PReLU alpha
            ],
            out_specs=pl.BlockSpec((tile_m, Hp), lambda i, k: (i, 0)),
            scratch_shapes=[pltpu.VMEM((tile_m, Cp), jnp.float32)],
        ),
        compiler_params=pltpu.CompilerParams(
            dimension_semantics=("parallel", "arbitrary")),
    )(A, X, X, Wl, Wr, b2, alpha2)


def build_mean_adjacency(edge_index, num_nodes):
    """Dense row-normalized adjacency for SAGEConv mean aggregation (f32).

    edge_index: (2, E) int; edge_index[0]=source, edge_index[1]=target.
    A[i, j] = (#edges j->i) / in_degree(i); zero-degree rows stay 0 (matches
    PyG scatter-mean semantics for isolated nodes)."""
    src = edge_index[0]
    dst = edge_index[1]
    adj = jnp.zeros((num_nodes, num_nodes), jnp.float32).at[dst, src].add(1.0)
    deg = adj.sum(axis=1, keepdims=True)
    return adj / jnp.where(deg == 0.0, 1.0, deg)


def init_encoder_params(key, in_channels, hidden_channels):
    """Deterministic synthetic init matching the module's parameter shapes."""
    params = []
    cin = in_channels
    for _ in range(3):
        k1, k2, k3, key = jax.random.split(key, 4)
        scale = 1.0 / jnp.sqrt(jnp.float32(cin))
        Wl = jax.random.uniform(k1, (cin, hidden_channels), jnp.float32, -scale, scale)
        Wr = jax.random.uniform(k2, (cin, hidden_channels), jnp.float32, -scale, scale)
        b = jax.random.uniform(k3, (hidden_channels,), jnp.float32, -scale, scale)
        alpha = jnp.full((hidden_channels,), 0.25, jnp.float32)  # PReLU default
        params.append((Wl, Wr, b, alpha))
        cin = hidden_channels
    return params


def encoder_forward(x, edge_index, batch_size, params):
    """Encoder.forward: 3x (SAGEConv(mean) + PReLU), then x[:batch_size]."""
    N, Cin = x.shape
    H = params[0][0].shape[1]
    lane = 128

    # Lane-dense padded channel widths.
    Cp0 = _round_up(Cin, lane)
    Hp = _round_up(H, lane)

    # Tile sizes: TK multiple of 128 (A lane dim), TM multiple of 8 (sublanes).
    # Clamp to padded N; pad N so both tiles divide it exactly.
    tk = min(512, _round_up(N, lane))
    tm = min(256, _round_up(N, lane))
    step = (tm * tk) // math.gcd(tm, tk)
    Np = _round_up(N, step)

    # Padded, bf16 adjacency (zero rows/cols for padded nodes => no effect).
    A = build_mean_adjacency(edge_index, N)
    A = jnp.pad(A, ((0, Np - N), (0, Np - N))).astype(jnp.bfloat16)

    # Padded, bf16 node features.
    h = jnp.pad(x, ((0, Np - N), (0, Cp0 - Cin))).astype(jnp.bfloat16)

    cin_p = Cp0
    out = None
    for (Wl, Wr, b, alpha) in params:
        cin, hch = Wl.shape
        Wl_p = jnp.pad(Wl, ((0, cin_p - cin), (0, Hp - hch))).astype(jnp.bfloat16)
        Wr_p = jnp.pad(Wr, ((0, cin_p - cin), (0, Hp - hch))).astype(jnp.bfloat16)
        b_p = jnp.pad(b, (0, Hp - hch)).reshape(1, Hp).astype(jnp.float32)
        a_p = jnp.pad(alpha, (0, Hp - hch)).reshape(1, Hp).astype(jnp.float32)

        out = sage_prelu_layer(A, h, Wl_p, Wr_p, b_p, a_p, tile_m=tm, tile_k=tk)
        h = out.astype(jnp.bfloat16)  # next-layer input (padded rows/cols inert)
        cin_p = Hp

    return out[:batch_size, :H]


def encoder_reference(x, edge_index, batch_size, params):
    """Pure-JAX f32 reference of the same forward pass."""
    N = x.shape[0]
    A = build_mean_adjacency(edge_index, N)
    h = x
    for (Wl, Wr, b, alpha) in params:
        agg = A @ h
        z = agg @ Wl + h @ Wr + b
        h = jnp.where(z > 0, z, alpha * z)
    return h[:batch_size]


if __name__ == "__main__":
    key = jax.random.PRNGKey(0)
    num_nodes = 16
    in_channels = 8
    hidden_channels = 32
    num_edges = 40
    batch_size = 8

    kx, ke1, ke2, kp = jax.random.split(key, 4)
    x = jax.random.normal(kx, (num_nodes, in_channels), jnp.float32)
    src = jax.random.randint(ke1, (num_edges,), 0, num_nodes)
    dst = jax.random.randint(ke2, (num_edges,), 0, num_nodes)
    edge_index = jnp.stack([src, dst], axis=0)  # (2, E)

    params = init_encoder_params(kp, in_channels, hidden_channels)

    out = encoder_forward(x, edge_index, batch_size, params)
    out = jax.block_until_ready(out)
    assert out.shape == (batch_size, hidden_channels)

    ref = jax.block_until_ready(encoder_reference(x, edge_index, batch_size, params))
    # bf16 inputs with f32 accumulation => loose tolerance.
    assert jnp.allclose(out, ref, atol=5e-2, rtol=5e-2), (
        float(jnp.max(jnp.abs(out - ref))))

    print("KERNEL_OK")
</pallas_src>

<mosaic_0001>
module attributes {stable_mosaic.version = 11 : i64} {
  func.func @_sage_prelu_kernel(%arg0: i32, %arg1: i32, %arg2: memref<128x128xbf16, #tpu.memory_space<vmem>>, %arg3: memref<128x128xbf16, #tpu.memory_space<vmem>>, %arg4: memref<128x128xbf16, #tpu.memory_space<vmem>>, %arg5: memref<128x128xbf16, #tpu.memory_space<vmem>>, %arg6: memref<128x128xbf16, #tpu.memory_space<vmem>>, %arg7: memref<1x128xf32, #tpu.memory_space<vmem>>, %arg8: memref<1x128xf32, #tpu.memory_space<vmem>>, %arg9: memref<128x128xf32, #tpu.memory_space<vmem>>, %arg10: memref<128x128xf32, #tpu.memory_space<vmem>>) attributes {dimension_semantics = [#tpu.dimension_semantics<parallel>, #tpu.dimension_semantics<arbitrary>], iteration_bounds = array<i64: 1, 1>, scalar_prefetch = 0 : i64, scratch_operands = 1 : i64, tpu.core_type = #tpu.core_type<tc>, window_params = [{transform_indices = @transform_0, window_bounds = array<i64: 128, 128>}, {transform_indices = @transform_1, window_bounds = array<i64: 128, 128>}, {transform_indices = @transform_2, window_bounds = array<i64: 128, 128>}, {pipeline_mode = #tpu.pipeline_mode<synchronous>, transform_indices = @transform_3, window_bounds = array<i64: 128, 128>}, {pipeline_mode = #tpu.pipeline_mode<synchronous>, transform_indices = @transform_4, window_bounds = array<i64: 128, 128>}, {pipeline_mode = #tpu.pipeline_mode<synchronous>, transform_indices = @transform_5, window_bounds = array<i64: 1, 128>}, {pipeline_mode = #tpu.pipeline_mode<synchronous>, transform_indices = @transform_6, window_bounds = array<i64: 1, 128>}, {transform_indices = @transform_7, window_bounds = array<i64: 128, 128>}]} {
    %c0_i32 = arith.constant 0 : i32
    %0 = arith.cmpi eq, %arg1, %c0_i32 : i32
    %1 = arith.extui %0 : i1 to i32
    %c0_i32_0 = arith.constant 0 : i32
    %2 = arith.cmpi ne, %1, %c0_i32_0 : i32
    scf.if %2 {
      %cst_10 = arith.constant 0.000000e+00 : f32
      %12 = vector.broadcast %cst_10 : f32 to vector<128x128xf32>
      %c0_11 = arith.constant 0 : index
      %c0_12 = arith.constant 0 : index
      %13 = vector.load %arg10[%c0_11, %c0_12] : memref<128x128xf32, #tpu.memory_space<vmem>>, vector<128x128xf32>
      tpu.vector_store %arg10[%c0_11, %c0_12], %12 {strides = array<i32>} : memref<128x128xf32, #tpu.memory_space<vmem>>, vector<128x128xf32>,
    } else {
    }
    %c0 = arith.constant 0 : index
    %c0_1 = arith.constant 0 : index
    %3 = vector.load %arg10[%c0, %c0_1] : memref<128x128xf32, #tpu.memory_space<vmem>>, vector<128x128xf32>
    %c0_2 = arith.constant 0 : index
    %c0_3 = arith.constant 0 : index
    %4 = vector.load %arg2[%c0_2, %c0_3] : memref<128x128xbf16, #tpu.memory_space<vmem>>, vector<128x128xbf16>
    %c0_4 = arith.constant 0 : index
    %c0_5 = arith.constant 0 : index
    %5 = vector.load %arg3[%c0_4, %c0_5] : memref<128x128xbf16, #tpu.memory_space<vmem>>, vector<128x128xbf16>
    %cst = arith.constant dense<0.000000e+00> : vector<128x128xf32>
    %6 = tpu.matmul %4, %5, %cst {dimension_numbers = #tpu.dot_dimension_numbers<[1], [0], [0], [1], [0, 0, 1, 1], [], []>} : vector<128x128xbf16>, vector<128x128xbf16>, vector<128x128xf32> -> vector<128x128xf32>
    %7 = arith.addf %3, %6 : vector<128x128xf32>
    %c0_6 = arith.constant 0 : index
    %c0_7 = arith.constant 0 : index
    %8 = vector.load %arg10[%c0_6, %c0_7] : memref<128x128xf32, #tpu.memory_space<vmem>>, vector<128x128xf32>
    tpu.vector_store %arg10[%c0_6, %c0_7], %7 {strides = array<i32>} : memref<128x128xf32, #tpu.memory_space<vmem>>, vector<128x128xf32>,
    %c0_i32_8 = arith.constant 0 : i32
    %9 = arith.cmpi eq, %arg1, %c0_i32_8 : i32
    %10 = arith.extui %9 : i1 to i32
    %c0_i32_9 = arith.constant 0 : i32
    %11 = arith.cmpi ne, %10, %c0_i32_9 : i32
    scf.if %11 {
      %c0_10 = arith.constant 0 : index
      %c0_11 = arith.constant 0 : index
      %12 = vector.load %arg10[%c0_10, %c0_11] : memref<128x128xf32, #tpu.memory_space<vmem>>, vector<128x128xf32>
      %13 = arith.truncf %12 : vector<128x128xf32> to vector<128x128xbf16>
      %c0_12 = arith.constant 0 : index
      %c0_13 = arith.constant 0 : index
      %14 = vector.load %arg5[%c0_12, %c0_13] : memref<128x128xbf16, #tpu.memory_space<vmem>>, vector<128x128xbf16>
      %cst_14 = arith.constant dense<0.000000e+00> : vector<128x128xf32>
      %15 = tpu.matmul %13, %14, %cst_14 {dimension_numbers = #tpu.dot_dimension_numbers<[1], [0], [0], [1], [0, 0, 1, 1], [], []>} : vector<128x128xbf16>, vector<128x128xbf16>, vector<128x128xf32> -> vector<128x128xf32>
      %c0_15 = arith.constant 0 : index
      %c0_16 = arith.constant 0 : index
      %16 = vector.load %arg4[%c0_15, %c0_16] : memref<128x128xbf16, #tpu.memory_space<vmem>>, vector<128x128xbf16>
      %c0_17 = arith.constant 0 : index
      %c0_18 = arith.constant 0 : index
      %17 = vector.load %arg6[%c0_17, %c0_18] : memref<128x128xbf16, #tpu.memory_space<vmem>>, vector<128x128xbf16>
      %cst_19 = arith.constant dense<0.000000e+00> : vector<128x128xf32>
      %18 = tpu.matmul %16, %17, %cst_19 {dimension_numbers = #tpu.dot_dimension_numbers<[1], [0], [0], [1], [0, 0, 1, 1], [], []>} : vector<128x128xbf16>, vector<128x128xbf16>, vector<128x128xf32> -> vector<128x128xf32>
      %19 = arith.addf %15, %18 : vector<128x128xf32>
      %c0_20 = arith.constant 0 : index
      %c0_21 = arith.constant 0 : index
      %20 = vector.load %arg7[%c0_20, %c0_21] : memref<1x128xf32, #tpu.memory_space<vmem>>, vector<1x128xf32>
      %21 = vector.broadcast %20 : vector<1x128xf32> to vector<128x128xf32>
      %22 = arith.addf %19, %21 : vector<128x128xf32>
      %c0_22 = arith.constant 0 : index
      %c0_23 = arith.constant 0 : index
      %23 = vector.load %arg8[%c0_22, %c0_23] : memref<1x128xf32, #tpu.memory_space<vmem>>, vector<1x128xf32>
      %cst_24 = arith.constant 0.000000e+00 : f32
      %24 = vector.broadcast %cst_24 : f32 to vector<128x128xf32>
      %25 = arith.cmpf ogt, %22, %24 : vector<128x128xf32>
      %26 = vector.broadcast %23 : vector<1x128xf32> to vector<128x128xf32>
      %27 = arith.mulf %26, %22 : vector<128x128xf32>
      %28 = arith.select %25, %22, %27 : vector<128x128xi1>, vector<128x128xf32>
      %c0_25 = arith.constant 0 : index
      %c0_26 = arith.constant 0 : index
      %29 = vector.load %arg9[%c0_25, %c0_26] : memref<128x128xf32, #tpu.memory_space<vmem>>, vector<128x128xf32>
      tpu.vector_store %arg9[%c0_25, %c0_26], %28 {strides = array<i32>} : memref<128x128xf32, #tpu.memory_space<vmem>>, vector<128x128xf32>,
    } else {
    }
    return
  }
  func.func @transform_0(%arg0: i32, %arg1: i32) -> (i32, i32) {
    %c0_i32 = arith.constant 0 : i32
    return %arg0, %arg1 : i32, i32
  }
  func.func @transform_1(%arg0: i32, %arg1: i32) -> (i32, i32) {
    %c0_i32 = arith.constant 0 : i32
    %c0_i32_0 = arith.constant 0 : i32
    return %arg1, %c0_i32 : i32, i32
  }
  func.func @transform_2(%arg0: i32, %arg1: i32) -> (i32, i32) {
    %c0_i32 = arith.constant 0 : i32
    %c0_i32_0 = arith.constant 0 : i32
    return %arg0, %c0_i32 : i32, i32
  }
  func.func @transform_3(%arg0: i32, %arg1: i32) -> (i32, i32) {
    %c0_i32 = arith.constant 0 : i32
    %c0_i32_0 = arith.constant 0 : i32
    %c0_i32_1 = arith.constant 0 : i32
    return %c0_i32, %c0_i32_0 : i32, i32
  }
  func.func @transform_4(%arg0: i32, %arg1: i32) -> (i32, i32) {
    %c0_i32 = arith.constant 0 : i32
    %c0_i32_0 = arith.constant 0 : i32
    %c0_i32_1 = arith.constant 0 : i32
    return %c0_i32, %c0_i32_0 : i32, i32
  }
  func.func @transform_5(%arg0: i32, %arg1: i32) -> (i32, i32) {
    %c0_i32 = arith.constant 0 : i32
    %c0_i32_0 = arith.constant 0 : i32
    %c0_i32_1 = arith.constant 0 : i32
    return %c0_i32, %c0_i32_0 : i32, i32
  }
  func.func @transform_6(%arg0: i32, %arg1: i32) -> (i32, i32) {
    %c0_i32 = arith.constant 0 : i32
    %c0_i32_0 = arith.constant 0 : i32
    %c0_i32_1 = arith.constant 0 : i32
    return %c0_i32, %c0_i32_0 : i32, i32
  }
  func.func @transform_7(%arg0: i32, %arg1: i32) -> (i32, i32) {
    %c0_i32 = arith.constant 0 : i32
    %c0_i32_0 = arith.constant 0 : i32
    return %arg0, %c0_i32 : i32, i32
  }
}

</mosaic_0001>

<bundles_post_ra>
// kernel: tpu_custom_call.1
= control target key start
LH: loop header
LB: loop body
LE: loop exit
PB: predicated region body
PF: predicated region fallthrough
CT: control target
= control target key end

     0   :  { %12 = vsyncpa [#allocation4], 0  ;;  %s1441_s0 = inlined_call_operand.hbm [shape: bf16[128,128], index: 0, kind: input, shape index: {}]   ;;  %s1442_s1 = inlined_call_operand.hbm [shape: bf16[128,128], index: 1, kind: input, shape index: {}]   ;;  %s1443_s2 = inlined_call_operand.hbm [shape: bf16[128,128], index: 2, kind: input, shape index: {}]   ;;  %s1444_s3 = inlined_call_operand.hbm [shape: bf16[128,128], index: 3, kind: input, shape index: {}]   ;;  %s1445_s4 = inlined_call_operand.hbm [shape: bf16[128,128], index: 4, kind: input, shape index: {}]   ;;  %s1446_s5 = inlined_call_operand.vmem [shape: f32[1,128], index: 5, kind: input, shape index: {}]   ;;  %s1447_s6 = inlined_call_operand.vmem [shape: f32[1,128], index: 6, kind: input, shape index: {}]   ;;  %s1448_s7 = inlined_call_operand.hbm [shape: f32[128,128], index: 7, kind: output, shape index: {}]  }
   0x1   :  { %13 = vsyncpa [#allocation7], 0 }
   0x2   :  { %14 = vsyncpa [#allocation10], 0 }
   0x3   :  { %15 = vsyncpa [#allocation5], 0  ;;  %s1295_s24 = smov [#allocation6]   ;;  %s1296_s26 = smov [#allocation9]  }
   0x4   :  { %s33_s25 = sshll.u32 %s1295_s24, 4  ;;  %s57_s27 = sshll.u32 %s1296_s26, 4  ;;  %s34_s25 = int_to_ptr.vmem [resolvable:$true] %s33_s25  ;;  %s58_s27 = int_to_ptr.vmem [resolvable:$true] %s57_s27 }
   0x5   :  { %s1175_s28 = scalar_lea.vmem %s34_s25, 1024  ;;  %p1180_p1 = scmp.lt.s32.totalorder %s34_s25, %s34_s25 }
   0x6   :  { %p1176_p0 = scmp.ne.s32.totalorder %s34_s25, %s1175_s28  ;;  %p1181_p2 = scmp.lt.s32.totalorder %s1175_s28, %s1175_s28 }
   0x8   :  { %p1182_p3 = por %p1181_p2, %p1180_p1 }
   0xa   :  { %p1183_p4 = pnand %p1182_p3, %p1176_p0 }
   0xc   :  { %1186 = shalt.err (!%p1183_p4)
}
   0xd   :  { %s1297_s29 = smov 64   ;;  %s1298_s30 = smov 4  }
   0xe   :  { %39 = dma.hbm_to_vmem [thread:$0]  %s1442_s1, 1024, %s34_s25, [#allocation7], %s1297_s29, %s1297_s29, %s1298_s30  }
   0xf   :  { %s1195_s10 = scalar_lea.vmem %s58_s27, 1024  ;;  %p1200_p6 = scmp.lt.s32.totalorder %s58_s27, %s58_s27 }
  0x10   :  { %p1196_p5 = scmp.ne.s32.totalorder %s58_s27, %s1195_s10  ;;  %p1201_p7 = scmp.lt.s32.totalorder %s1195_s10, %s1195_s10 }
  0x12   :  { %p1202_p8 = por %p1201_p7, %p1200_p6 }
  0x14   :  { %p1203_p9 = pnand %p1202_p8, %p1196_p5 }
  0x16   :  { %1206 = shalt.err (!%p1203_p9)
}
  0x17   :  { %63 = dma.hbm_to_vmem [thread:$0]  %s1444_s3, 1024, %s58_s27, [#allocation10], %s1297_s29, %s1297_s29, %s1298_s30  }
  0x18   :  { %s1299_s13 = smov [#allocation3]   ;;  %s1300_s15 = smov [#allocation8]  }
  0x19   :  { %s21_s14 = sshll.u32 %s1299_s13, 4  ;;  %s45_s16 = sshll.u32 %s1300_s15, 4  ;;  %s22_s14 = int_to_ptr.vmem [resolvable:$true] %s21_s14  ;;  %s46_s16 = int_to_ptr.vmem [resolvable:$true] %s45_s16 }
  0x1a   :  { %s1215_s1 = scalar_lea.vmem %s22_s14, 1024  ;;  %p1220_p11 = scmp.lt.s32.totalorder %s22_s14, %s22_s14 }
  0x1b   :  { %p1216_p10 = scmp.ne.s32.totalorder %s22_s14, %s1215_s1  ;;  %p1221_p12 = scmp.lt.s32.totalorder %s1215_s1, %s1215_s1 }
  0x1d   :  { %p1222_p13 = por %p1221_p12, %p1220_p11 }
  0x1f   :  { %p1223_p0 = pnand %p1222_p13, %p1216_p10 }
  0x21   :  { %1226 = shalt.err (!%p1223_p0)
}
  0x22   :  { %27 = dma.hbm_to_vmem [thread:$0]  %s1441_s0, 1024, %s22_s14, [#allocation4], %s1297_s29, %s1297_s29, %s1298_s30  }
  0x23   :  { %s1235_s3 = scalar_lea.vmem %s46_s16, 1024  ;;  %p1240_p2 = scmp.lt.s32.totalorder %s46_s16, %s46_s16 }
  0x24   :  { %p1236_p1 = scmp.ne.s32.totalorder %s46_s16, %s1235_s3  ;;  %p1241_p3 = scmp.lt.s32.totalorder %s1235_s3, %s1235_s3 }
  0x26   :  { %p1242_p4 = por %p1241_p3, %p1240_p2 }
  0x28   :  { %p1243_p5 = pnand %p1242_p4, %p1236_p1 }
  0x2a   :  { %1246 = shalt.err (!%p1243_p5)
}
  0x2b   :  { %51 = dma.hbm_to_vmem [thread:$0]  %s1443_s2, 1024, %s46_s16, [#allocation7], %s1297_s29, %s1297_s29, %s1298_s30  }
  0x2c   :  { %s1301_s21 = smov [#allocation11]  }
  0x2d   :  { %s69_s22 = sshll.u32 %s1301_s21, 4  ;;  %s70_s22 = int_to_ptr.vmem [resolvable:$true] %s69_s22 }
  0x2e   :  { %s1255_s23 = scalar_lea.vmem %s70_s22, 1024  ;;  %p1260_p7 = scmp.lt.s32.totalorder %s70_s22, %s70_s22 }
  0x2f   :  { %p1256_p6 = scmp.ne.s32.totalorder %s70_s22, %s1255_s23  ;;  %p1261_p8 = scmp.lt.s32.totalorder %s1255_s23, %s1255_s23 }
  0x31   :  { %p1262_p9 = por %p1261_p8, %p1260_p7 }
  0x33   :  { %p1263_p10 = pnand %p1262_p9, %p1256_p6 }
  0x35   :  { %1266 = shalt.err (!%p1263_p10)
}
  0x36   :  { %75 = dma.hbm_to_vmem [thread:$0]  %s1445_s4, 1024, %s70_s22, [#allocation10], %s1297_s29, %s1297_s29, %s1298_s30  }
  0x37   :  { %1287 = dma.done.wait [#allocation4], 1024  }
  0x38   :  { %1288 = vsyncadd [#allocation4], 4294966272 }
  0x39   :  { %1289 = dma.done.wait [#allocation7], 2048  }
  0x3a   :  { %1290 = vsyncadd [#allocation7], 4294965248 }
  0x3b   :  { %1291 = dma.done.wait [#allocation10], 2048  }
  0x3c   :  { %1292 = vsyncadd [#allocation10], 4294965248  ;;  %v1127_v0 = vld [vmem:[#allocation6 + $0x38] sm:$0xff]   ;;  %v1128_v1 = vld [vmem:[#allocation6 + $0x30] sm:$0xff]  }
  0x3d   :  { %1005 = vmatprep.subr.bf16.mxu0 %v1127_v0  ;;  %v1129_v2 = vld [vmem:[#allocation6 + $0x28] sm:$0xff]   ;;  %v1130_v3 = vld [vmem:[#allocation6 + $0x20] sm:$0xff]   ;;  %v1131_v5 = vld [vmem:[#allocation6 + $0x18] sm:$0xff]  }
  0x3e   :  { %1006 = vmatpush3.bf16.msra.mxu0 %v1127_v0  ;;  %v1135_v4 = vld [vmem:[#allocation3] sm:$0xff]   ;;  %v1132_v6 = vld [vmem:[#allocation6 + $0x10] sm:$0xff]   ;;  %v1143_v7 = vld [vmem:[#allocation11 + $0x38] sm:$0xff]  }
  0x3f   :  { %1007 = vmatprep.subr.bf16.mxu0 %v1128_v1  ;;  %1021 = vmatprep.mubr.bf16.mxu0 %v1135_v4  ;;  %v1144_v8 = vld [vmem:[#allocation11 + $0x30] sm:$0xff]   ;;  %v1133_v9 = vld [vmem:[#allocation6 + $0x8] sm:$0xff]   ;;  %v1134_v11 = vld [vmem:[#allocation6] sm:$0xff]  }
  0x40   :  { %1037 = vmatprep.subr.bf16.mxu1 %v1143_v7  ;;  %v1145_v10 = vld [vmem:[#allocation11 + $0x28] sm:$0xff]   ;;  %v1146_v12 = vld [vmem:[#allocation11 + $0x20] sm:$0xff]   ;;  %v1147_v13 = vld [vmem:[#allocation11 + $0x18] sm:$0xff]  }
  0x41   :  { %1038 = vmatpush3.bf16.msra.mxu1 %v1143_v7  ;;  %v1154_v14 = vld [vmem:[#allocation8] sm:$0xff]   ;;  %v1149_v15 = vld [vmem:[#allocation9 + $0x38] sm:$0xff]   ;;  %v1136_v16 = vld [vmem:[#allocation3 + $0x8] sm:$0xff]  }
  0x42   :  { %1008 = vmatpush3.bf16.msra.mxu0 %v1128_v1  ;;  %1039 = vmatprep.subr.bf16.mxu1 %v1144_v8  ;;  %v1137_v17 = vld [vmem:[#allocation3 + $0x10] sm:$0xff]   ;;  %v1150_v20 = vld [vmem:[#allocation11 + $0x8] sm:$0xff]   ;;  %v1138_v22 = vld [vmem:[#allocation3 + $0x18] sm:$0xff]  }
  0x43   :  { %1009 = vmatprep.subr.bf16.mxu0 %v1129_v2  ;;  %1053 = vmatprep.mubr.bf16.mxu1 %v1154_v14  ;;  %v1148_v18 = vld [vmem:[#allocation11 + $0x10] sm:$0xff]   ;;  %v1153_v21 = vld [vmem:[#allocation9 + $0x28] sm:$0xff]   ;;  %v1139_v23 = vld [vmem:[#allocation3 + $0x20] sm:$0xff]  }
  0x44   :  { %v1151_v19 = vld [vmem:[#allocation9 + $0x30] sm:$0xff]   ;;  %v1152_v24 = vld [vmem:[#allocation11] sm:$0xff]   ;;  %v1157_v26 = vld [vmem:[#allocation9 + $0x18] sm:$0xff]  }
  0x45   :  { %1040 = vmatpush3.bf16.msra.mxu1 %v1144_v8  ;;  %v1156_v25 = vld [vmem:[#allocation9 + $0x20] sm:$0xff]   ;;  %v1140_v27 = vld [vmem:[#allocation3 + $0x28] sm:$0xff]   ;;  %v1141_v29 = vld [vmem:[#allocation3 + $0x30] sm:$0xff]  }
  0x46   :  { %1010 = vmatpush3.bf16.msra.mxu0 %v1129_v2  ;;  %1041 = vmatprep.subr.bf16.mxu1 %v1145_v10  ;;  %v1155_v28 = vld [vmem:[#allocation8 + $0x8] sm:$0xff]   ;;  %v1158_v30 = vld [vmem:[#allocation8 + $0x10] sm:$0xff]   ;;  %v1142_v32 = vld [vmem:[#allocation3 + $0x38] sm:$0xff]  }
  0x47   :  { %1011 = vmatprep.subr.bf16.mxu0 %v1130_v3  ;;  %v1160_v31 = vld [vmem:[#allocation9 + $0x10] sm:$0xff]   ;;  %v1159_v33 = vld [vmem:[#allocation8 + $0x18] sm:$0xff]   ;;  %v1161_v34 = vld [vmem:[#allocation9 + $0x8] sm:$0xff]  }
  0x48   :  { %v1162_v35 = vld [vmem:[#allocation8 + $0x20] sm:$0xff]   ;;  %v1163_v36 = vld [vmem:[#allocation8 + $0x28] sm:$0xff]   ;;  %v1165_v38 = vld [vmem:[#allocation8 + $0x30] sm:$0xff]  }
  0x49   :  { %1042 = vmatpush3.bf16.msra.mxu1 %v1145_v10  ;;  %v1164_v37 = vld [vmem:[#allocation9] sm:$0xff]   ;;  %v1166_v39 = vld [vmem:[#allocation8 + $0x38] sm:$0xff]  }
  0x4a   :  { %1012 = vmatpush3.bf16.msra.mxu0 %v1130_v3  ;;  %1043 = vmatprep.subr.bf16.mxu1 %v1146_v12 }
  0x4b   :  { %1013 = vmatprep.subr.bf16.mxu0 %v1131_v5 }
  0x4d   :  { %1044 = vmatpush3.bf16.msra.mxu1 %v1146_v12 }
  0x4e   :  { %1014 = vmatpush3.bf16.msra.mxu0 %v1131_v5  ;;  %1045 = vmatprep.subr.bf16.mxu1 %v1147_v13 }
  0x4f   :  { %1015 = vmatprep.subr.bf16.mxu0 %v1132_v6 }
  0x51   :  { %1046 = vmatpush3.bf16.msra.mxu1 %v1147_v13  ;;  %v1384_v13 = vld [vmem:[%s1446_s5] ss:$0 sm:$0xff]  ;;  %s1302_s5 = smov [#allocation12]  }
  0x52   :  { %1016 = vmatpush3.bf16.msra.mxu0 %v1132_v6  ;;  %1047 = vmatprep.subr.bf16.mxu1 %v1148_v18 }
  0x53   :  { %1017 = vmatprep.subr.bf16.mxu0 %v1133_v9 }
  0x55   :  { %1048 = vmatpush3.bf16.msra.mxu1 %v1148_v18 }
  0x56   :  { %1018 = vmatpush3.bf16.msra.mxu0 %v1133_v9  ;;  %1049 = vmatprep.subr.bf16.mxu1 %v1150_v20 }
  0x57   :  { %1019 = vmatprep.subr.bf16.mxu0 %v1134_v11 }
  0x59   :  { %1050 = vmatpush3.bf16.msra.mxu1 %v1150_v20 }
  0x5a   :  { %1020 = vmatpush3.bf16.msra.mxu0 %v1134_v11  ;;  %1051 = vmatprep.subr.bf16.mxu1 %v1152_v24 }
  0x5b   :  { %1069 = vmatprep.subr.bf16.mxu0 %v1149_v15 }
  0x5d   :  { %1022 = vmatmul.mubr.bf16.vlgmr.msra.gmra.mxu0 %v1136_v16  ;;  %1052 = vmatpush3.bf16.msra.mxu1 %v1152_v24 }
  0x5e   :  { %1025 = vmatprep.mubr.bf16.mxu0 %v1137_v17  ;;  %1070 = vmatpush3.bf16.msra.mxu0 %v1149_v15 }
  0x5f   :  { %1071 = vmatprep.subr.bf16.mxu0 %v1151_v19  ;;  %1101 = vmatprep.subr.bf16.mxu1 %v1149_v15 }
  0x60   :  { %1054 = vmatmul.mubr.bf16.vlgmr.msra.gmra.mxu1 %v1155_v28 }
  0x61   :  { %1109 = vmatpush3.bf16.msra.mxu1 %v1149_v15  ;;  %1057 = vmatprep.mubr.bf16.mxu1 %v1158_v30  ;;  %v1389_v15 = vld [vmem:[%s1447_s6] ss:$0 sm:$0xff]  ;;  %s901_s6 = sshll.u32 %s1302_s5, 4  ;;  %s902_s6 = int_to_ptr.vmem [resolvable:$true] %s901_s6 }
  0x62   :  { %1072 = vmatpush3.bf16.msra.mxu0 %v1151_v19  ;;  %1102 = vmatprep.subr.bf16.mxu1 %v1151_v19  ;;  %s1267_s27 = scalar_lea.vmem %s902_s6, 2048  ;;  %p1272_p12 = scmp.lt.s32.totalorder %s902_s6, %s902_s6 }
  0x63   :  { %1073 = vmatprep.subr.bf16.mxu0 %v1153_v21  ;;  %p1268_p11 = scmp.ne.s32.totalorder %s902_s6, %s1267_s27  ;;  %p1273_p13 = scmp.lt.s32.totalorder %s1267_s27, %s1267_s27 }
  0x65   :  { %1026 = vmatmul.mubr.bf16.gmra.mxu0 %v1138_v22  ;;  %1110 = vmatpush3.bf16.msra.mxu1 %v1151_v19  ;;  %p1274_p0 = por %p1273_p13, %p1272_p12 }
  0x66   :  { %1029 = vmatprep.mubr.bf16.mxu0 %v1139_v23  ;;  %1074 = vmatpush3.bf16.msra.mxu0 %v1153_v21 }
  0x67   :  { %1075 = vmatprep.subr.bf16.mxu0 %v1156_v25  ;;  %1103 = vmatprep.subr.bf16.mxu1 %v1153_v21  ;;  %p1275_p1 = pnand %p1274_p0, %p1268_p11 }
  0x68   :  { %1058 = vmatmul.mubr.bf16.gmra.mxu1 %v1159_v33 }
  0x69   :  { %1111 = vmatpush3.bf16.msra.mxu1 %v1153_v21  ;;  %1061 = vmatprep.mubr.bf16.mxu1 %v1162_v35 }
  0x6a   :  { %1076 = vmatpush3.bf16.msra.mxu0 %v1156_v25  ;;  %1104 = vmatprep.subr.bf16.mxu1 %v1156_v25 }
  0x6b   :  { %1077 = vmatprep.subr.bf16.mxu0 %v1157_v26 }
  0x6d   :  { %1030 = vmatmul.mubr.bf16.gmra.mxu0 %v1140_v27  ;;  %1112 = vmatpush3.bf16.msra.mxu1 %v1156_v25 }
  0x6e   :  { %1033 = vmatprep.mubr.bf16.mxu0 %v1141_v29  ;;  %1078 = vmatpush3.bf16.msra.mxu0 %v1157_v26 }
  0x6f   :  { %1079 = vmatprep.subr.bf16.mxu0 %v1160_v31  ;;  %1105 = vmatprep.subr.bf16.mxu1 %v1157_v26 }
  0x70   :  { %1062 = vmatmul.mubr.bf16.gmra.mxu1 %v1163_v36 }
  0x71   :  { %1113 = vmatpush3.bf16.msra.mxu1 %v1157_v26  ;;  %1065 = vmatprep.mubr.bf16.mxu1 %v1165_v38 }
  0x72   :  { %1080 = vmatpush3.bf16.msra.mxu0 %v1160_v31  ;;  %1106 = vmatprep.subr.bf16.mxu1 %v1160_v31 }
  0x73   :  { %1081 = vmatprep.subr.bf16.mxu0 %v1161_v34 }
  0x75   :  { %1034 = vmatmul.mubr.bf16.gmra.mxu0 %v1142_v32  ;;  %1114 = vmatpush3.bf16.msra.mxu1 %v1160_v31 }
  0x76   :  { %1107 = vmatprep.subr.bf16.mxu1 %v1161_v34  ;;  %1082 = vmatpush3.bf16.msra.mxu0 %v1161_v34 }
  0x77   :  { %1083 = vmatprep.subr.bf16.mxu0 %v1164_v37 }
  0x78   :  { %1066 = vmatmul.mubr.bf16.gmra.mxu1 %v1166_v39 }
  0x79   :  { %1115 = vmatpush3.bf16.msra.mxu1 %v1161_v34 }
  0x7a   :  { %1108 = vmatprep.subr.bf16.mxu1 %v1164_v37  ;;  %1084 = vmatpush3.bf16.msra.mxu0 %v1164_v37 }
  0x7d   :  { %1116 = vmatpush3.bf16.msra.mxu1 %v1164_v37 }
 0x11d   :  { %v1023_v40 = vpop.f32.mrf.mxu0 }
 0x11f   :  { %v294_v41 = vpop.f32.mrf.mxu0 }
 0x120   :  { %v1055_v0 = vpop.f32.mrf.mxu1 }
 0x121   :  { %v1024_v42 = vpop.f32.mrf.mxu0 }
 0x122   :  { %v409_v45 = vpack.c.bf16 %v1024_v42, %v1023_v40  ;;  %v594_v1 = vpop.f32.mrf.mxu1 }
 0x123   :  { %v297_v43 = vpop.f32.mrf.mxu0 }
 0x124   :  { %v408_v44 = vpack.c.bf16 %v297_v43, %v294_v41  ;;  %v1056_v2 = vpop.f32.mrf.mxu1 }
 0x125   :  { %v1027_v46 = vpop.f32.mrf.mxu0 }
 0x126   :  { %1085 = vmatprep.mubr.bf16.mxu0 %v408_v44  ;;  %v597_v3 = vpop.f32.mrf.mxu1 }
 0x127   :  { %v310_v47 = vpop.f32.mrf.mxu0  ;;  %1086 = vmatmul.mubr.bf16.vlgmr.msra.gmra.mxu0 %v409_v45 }
 0x128   :  { %v1059_v4 = vpop.f32.mrf.mxu1 }
 0x129   :  { %v1028_v48 = vpop.f32.mrf.mxu0 }
 0x12a   :  { %v411_v51 = vpack.c.bf16 %v1028_v48, %v1027_v46  ;;  %v610_v5 = vpop.f32.mrf.mxu1 }
 0x12b   :  { %v313_v49 = vpop.f32.mrf.mxu0 }
 0x12c   :  { %v410_v50 = vpack.c.bf16 %v313_v49, %v310_v47  ;;  %v1060_v6 = vpop.f32.mrf.mxu1 }
 0x12d   :  { %v1031_v52 = vpop.f32.mrf.mxu0 }
 0x12e   :  { %1089 = vmatprep.mubr.bf16.mxu0 %v410_v50  ;;  %v613_v7 = vpop.f32.mrf.mxu1 }
 0x12f   :  { %v326_v53 = vpop.f32.mrf.mxu0  ;;  %1090 = vmatmul.mubr.bf16.gmra.mxu0 %v411_v51 }
 0x130   :  { %v1063_v8 = vpop.f32.mrf.mxu1 }
 0x131   :  { %v1032_v54 = vpop.f32.mrf.mxu0 }
 0x132   :  { %v413_v57 = vpack.c.bf16 %v1032_v54, %v1031_v52  ;;  %v1375_v9 = vpop.f32.mrf.mxu1 }
 0x133   :  { %v329_v55 = vpop.f32.mrf.mxu0 }
 0x134   :  { %v412_v56 = vpack.c.bf16 %v329_v55, %v326_v53  ;;  %v1377_v10 = vpop.f32.mrf.mxu1 }
 0x135   :  { %v1035_v58 = vpop.f32.mrf.mxu0 }
 0x136   :  { %1093 = vmatprep.mubr.bf16.mxu1 %v412_v56  ;;  %v1379_v11 = vpop.f32.mrf.mxu1 }
 0x137   :  { %v342_v59 = vpop.f32.mrf.mxu0  ;;  %1094 = vmatmul.mubr.bf16.vlgmr.msra.gmra.mxu1 %v413_v57 }
 0x138   :  { %v1391_v16 = vpop.f32.mrf.mxu1 }
 0x139   :  { %v1036_v60 = vpop.f32.mrf.mxu0 }
 0x13a   :  { %v415_v63 = vpack.c.bf16 %v1036_v60, %v1035_v58  ;;  %v1396_v24 = vpop.f32.mrf.mxu1 }
 0x13b   :  { %v345_v61 = vpop.f32.mrf.mxu0 }
 0x13c   :  { %v414_v62 = vpack.c.bf16 %v345_v61, %v342_v59  ;;  %v1401_v34 = vpop.f32.mrf.mxu1 }
 0x13e   :  { %1097 = vmatprep.mubr.bf16.mxu1 %v414_v62  ;;  %v1408_v46 = vpop.f32.mrf.mxu1 }
 0x13f   :  { %1098 = vmatmul.mubr.bf16.gmra.mxu1 %v415_v63 }
 0x1e7   :  { %v1087_v12 = vpop.f32.mrf.mxu0 }
 0x1e8   :  { %v748_v14 = vadd.f32 %v1087_v12, %v1055_v0 }
 0x1e9   :  { %v739_v17 = vpop.f32.mrf.mxu0 }
 0x1ea   :  { %v811_v18 = vadd.f32 %v1384_v13, %v748_v14  ;;  %v740_v19 = vadd.f32 %v739_v17, %v594_v1 }
 0x1eb   :  { %v1088_v20 = vpop.f32.mrf.mxu0 }
 0x1ec   :  { %vm828_vm0 = vcmp.gt.f32.partialorder %v811_v18, 0.0  ;;  %v850_v21 = vmul.f32 %v1389_v15, %v811_v18  ;;  %v809_v22 = vadd.f32 %v1384_v13, %v740_v19  ;;  %v751_v23 = vadd.f32 %v1088_v20, %v1056_v2 }
 0x1ed   :  { %v742_v25 = vpop.f32.mrf.mxu0 }
 0x1ee   :  { %v866_v26 = vsel %vm828_vm0, %v811_v18, %v850_v21  ;;  %vm826_vm1 = vcmp.gt.f32.partialorder %v809_v22, 0.0  ;;  %v848_v27 = vmul.f32 %v1389_v15, %v809_v22  ;;  %v812_v28 = vadd.f32 %v1384_v13, %v751_v23 }
 0x1ef   :  { %882 = vst [vmem:[#allocation12 + $0x10] sm:$0xff] %v866_v26  ;;  %v743_v29 = vadd.f32 %v742_v25, %v597_v3  ;;  %v1091_v30 = vpop.f32.mrf.mxu0 }
 0x1f0   :  { %v864_v31 = vsel %vm826_vm1, %v809_v22, %v848_v27  ;;  %vm829_vm2 = vcmp.gt.f32.partialorder %v812_v28, 0.0  ;;  %v851_v32 = vmul.f32 %v1389_v15, %v812_v28  ;;  %v764_v33 = vadd.f32 %v1091_v30, %v1059_v4 }
 0x1f1   :  { %880 = vst [vmem:[#allocation12] sm:$0xff] %v864_v31  ;;  %v810_v35 = vadd.f32 %v1384_v13, %v743_v29  ;;  %v755_v36 = vpop.f32.mrf.mxu0 }
 0x1f2   :  { %v867_v37 = vsel %vm829_vm2, %v812_v28, %v851_v32  ;;  %v815_v38 = vadd.f32 %v1384_v13, %v764_v33  ;;  %v756_v39 = vadd.f32 %v755_v36, %v610_v5 }
 0x1f3   :  { %883 = vst [vmem:[#allocation12 + $0x18] sm:$0xff] %v867_v37  ;;  %vm827_vm3 = vcmp.gt.f32.partialorder %v810_v35, 0.0  ;;  %v849_v40 = vmul.f32 %v1389_v15, %v810_v35  ;;  %v1092_v41 = vpop.f32.mrf.mxu0 }
 0x1f4   :  { %vm832_vm4 = vcmp.gt.f32.partialorder %v815_v38, 0.0  ;;  %v854_v42 = vmul.f32 %v1389_v15, %v815_v38  ;;  %v813_v43 = vadd.f32 %v1384_v13, %v756_v39  ;;  %v767_v44 = vadd.f32 %v1092_v41, %v1060_v6 }
 0x1f5   :  { %v865_v45 = vsel %vm827_vm3, %v810_v35, %v849_v40  ;;  %v758_v47 = vpop.f32.mrf.mxu0 }
 0x1f6   :  { %881 = vst [vmem:[#allocation12 + $0x8] sm:$0xff] %v865_v45  ;;  %v870_v48 = vsel %vm832_vm4, %v815_v38, %v854_v42  ;;  %vm830_vm5 = vcmp.gt.f32.partialorder %v813_v43, 0.0  ;;  %v852_v49 = vmul.f32 %v1389_v15, %v813_v43  ;;  %v816_v50 = vadd.f32 %v1384_v13, %v767_v44 }
 0x1f7   :  { %886 = vst [vmem:[#allocation12 + $0x30] sm:$0xff] %v870_v48  ;;  %v759_v51 = vadd.f32 %v758_v47, %v613_v7  ;;  %v1095_v52 = vpop.f32.mrf.mxu1 }
 0x1f8   :  { %v868_v53 = vsel %vm830_vm5, %v813_v43, %v852_v49  ;;  %vm833_vm6 = vcmp.gt.f32.partialorder %v816_v50, 0.0  ;;  %v855_v54 = vmul.f32 %v1389_v15, %v816_v50  ;;  %v780_v55 = vadd.f32 %v1095_v52, %v1063_v8 }
 0x1f9   :  { %884 = vst [vmem:[#allocation12 + $0x20] sm:$0xff] %v868_v53  ;;  %v814_v56 = vadd.f32 %v1384_v13, %v759_v51  ;;  %v771_v57 = vpop.f32.mrf.mxu1 }
 0x1fa   :  { %v871_v58 = vsel %vm833_vm6, %v816_v50, %v855_v54  ;;  %v819_v59 = vadd.f32 %v1384_v13, %v780_v55  ;;  %v772_v60 = vadd.f32 %v771_v57, %v1375_v9 }
 0x1fb   :  { %887 = vst [vmem:[#allocation12 + $0x38] sm:$0xff] %v871_v58  ;;  %vm831_vm7 = vcmp.gt.f32.partialorder %v814_v56, 0.0  ;;  %v853_v61 = vmul.f32 %v1389_v15, %v814_v56  ;;  %v1096_v62 = vpop.f32.mrf.mxu1 }
 0x1fc   :  { %vm836_vm8 = vcmp.gt.f32.partialorder %v819_v59, 0.0  ;;  %v858_v63 = vmul.f32 %v1389_v15, %v819_v59  ;;  %v817_v0 = vadd.f32 %v1384_v13, %v772_v60  ;;  %v783_v1 = vadd.f32 %v1096_v62, %v1377_v10 }
 0x1fd   :  { %v869_v2 = vsel %vm831_vm7, %v814_v56, %v853_v61  ;;  %v774_v3 = vpop.f32.mrf.mxu1 }
 0x1fe   :  { %885 = vst [vmem:[#allocation12 + $0x28] sm:$0xff] %v869_v2  ;;  %v874_v4 = vsel %vm836_vm8, %v819_v59, %v858_v63  ;;  %vm834_vm9 = vcmp.gt.f32.partialorder %v817_v0, 0.0  ;;  %v856_v5 = vmul.f32 %v1389_v15, %v817_v0  ;;  %v820_v6 = vadd.f32 %v1384_v13, %v783_v1 }
 0x1ff   :  { %890 = vst [vmem:[#allocation12 + $0x50] sm:$0xff] %v874_v4  ;;  %v775_v7 = vadd.f32 %v774_v3, %v1379_v11  ;;  %v1099_v8 = vpop.f32.mrf.mxu1 }
 0x200   :  { %v872_v9 = vsel %vm834_vm9, %v817_v0, %v856_v5  ;;  %vm837_vm10 = vcmp.gt.f32.partialorder %v820_v6, 0.0  ;;  %v859_v12 = vmul.f32 %v1389_v15, %v820_v6  ;;  %v796_v14 = vadd.f32 %v1099_v8, %v1391_v16 }
 0x201   :  { %888 = vst [vmem:[#allocation12 + $0x40] sm:$0xff] %v872_v9  ;;  %v818_v10 = vadd.f32 %v1384_v13, %v775_v7  ;;  %v787_v17 = vpop.f32.mrf.mxu1 }
 0x202   :  { %v875_v18 = vsel %vm837_vm10, %v820_v6, %v859_v12  ;;  %v823_v19 = vadd.f32 %v1384_v13, %v796_v14  ;;  %v788_v20 = vadd.f32 %v787_v17, %v1396_v24 }
 0x203   :  { %891 = vst [vmem:[#allocation12 + $0x58] sm:$0xff] %v875_v18  ;;  %vm835_vm11 = vcmp.gt.f32.partialorder %v818_v10, 0.0  ;;  %v857_v11 = vmul.f32 %v1389_v15, %v818_v10  ;;  %v1100_v21 = vpop.f32.mrf.mxu1 }
 0x204   :  { %vm840_vm12 = vcmp.gt.f32.partialorder %v823_v19, 0.0  ;;  %v862_v22 = vmul.f32 %v1389_v15, %v823_v19  ;;  %v821_v23 = vadd.f32 %v1384_v13, %v788_v20  ;;  %v799_v16 = vadd.f32 %v1100_v21, %v1401_v34 }
 0x205   :  { %v873_v25 = vsel %vm835_vm11, %v818_v10, %v857_v11  ;;  %v790_v26 = vpop.f32.mrf.mxu1 }
 0x206   :  { %889 = vst [vmem:[#allocation12 + $0x48] sm:$0xff] %v873_v25  ;;  %v878_v27 = vsel %vm840_vm12, %v823_v19, %v862_v22  ;;  %vm838_vm13 = vcmp.gt.f32.partialorder %v821_v23, 0.0  ;;  %v860_v28 = vmul.f32 %v1389_v15, %v821_v23  ;;  %v824_v24 = vadd.f32 %v1384_v13, %v799_v16 }
 0x207   :  { %894 = vst [vmem:[#allocation12 + $0x70] sm:$0xff] %v878_v27  ;;  %v791_v29 = vadd.f32 %v790_v26, %v1408_v46 }
 0x208   :  { %v876_v30 = vsel %vm838_vm13, %v821_v23, %v860_v28  ;;  %vm841_vm14 = vcmp.gt.f32.partialorder %v824_v24, 0.0  ;;  %v863_v31 = vmul.f32 %v1389_v15, %v824_v24 }
 0x209   :  { %892 = vst [vmem:[#allocation12 + $0x60] sm:$0xff] %v876_v30  ;;  %v822_v32 = vadd.f32 %v1384_v13, %v791_v29 }
 0x20a   :  { %v879_v33 = vsel %vm841_vm14, %v824_v24, %v863_v31 }
 0x20b   :  { %895 = vst [vmem:[#allocation12 + $0x78] sm:$0xff] %v879_v33  ;;  %vm839_vm15 = vcmp.gt.f32.partialorder %v822_v32, 0.0  ;;  %v861_v34 = vmul.f32 %v1389_v15, %v822_v32 }
 0x20d   :  { %v877_v35 = vsel %vm839_vm15, %v822_v32, %v861_v34 }
 0x20e   :  { %893 = vst [vmem:[#allocation12 + $0x68] sm:$0xff] %v877_v35 }
 0x20f   :  { %1278 = shalt.err (!%p1275_p1)
}
 0x210   :  { %s1303_s28 = smov 128   ;;  %s1304_s29 = smov 8  }
 0x211   :  { %907 = dma.vmem_to_hbm [thread:$0]  %s902_s6, 2048, %s1448_s7, [#allocation5], %s1303_s28, %s1303_s28, %s1304_s29  }
 0x212   :  { %1293 = dma.done.wait [#allocation5], 2048  }
 0x213   :  { %1294 = vsyncadd [#allocation5], 4294965248 }
 0x214   :  { %911 = vsyncpa [#allocation4], 1 }
 0x215   :  { %912 = vsyncpa [#allocation7], 1 }
 0x216   :  { %913 = vsyncpa [#allocation10], 1 }
 0x217   :  { %914 = vsyncpa [#allocation5], 1 }

</bundles_post_ra>
